<compile_context>
chip_gen: v5e
topology: v5e:2x2
jax: 0.10.0
libtpu: 0.0.40
codegen_flags: <defaults>
</compile_context>

<pallas_src>
import functools

import jax
import jax.numpy as jnp
from jax.experimental import pallas as pl
from jax.experimental.pallas import tpu as pltpu


def _rope_half_cache_kernel(inv_freq_ref, cos_ref, sin_ref, *, pack):
    """Fills one (tile_rows, pack*half) block of the packed half-width caches.

    Packed layout: row r, lane c  ->  position r*pack + c // half,
                                      frequency  inv_freq[c % half].
    inv_freq_ref : (1, pack*half) f32, grid-invariant.
    """
    i = pl.program_id(0)
    tile_rows, lane_w = cos_ref.shape

    # Exact integer positions, cast to f32 once (torch: int64 arange -> .float()).
    row = jax.lax.broadcasted_iota(jnp.int32, (tile_rows, lane_w), 0)
    pos = (i * tile_rows + row) * pack
    if pack > 1:
        # half is a divisor of 128 in the packed branch -> power of two -> shift.
        half = lane_w // pack
        lane = jax.lax.broadcasted_iota(jnp.int32, (tile_rows, lane_w), 1)
        pos = pos + (lane >> (half.bit_length() - 1))

    ang = pos.astype(jnp.float32) * inv_freq_ref[...]          # (1, lane_w) broadcast
    cos_ref[...] = jnp.cos(ang).astype(cos_ref.dtype)
    sin_ref[...] = jnp.sin(ang).astype(sin_ref.dtype)


def _round_up(x, m):
    return (x + m - 1) // m * m


def _pick_tile_rows(rows, row_align, cap=4096):
    """Choose (tile_rows, padded_rows).

    * tile_rows is sublane-aligned and never exceeds `cap` rows (VMEM safety),
    * when rows >= 2*row_align it is also capped at rows//2 so the grid has at
      least two "parallel" steps (v7x megacore sharding),
    * padded_rows > rows only when `rows` has no aligned divisor <= the cap;
      the caller slices the computed tail away.
    """
    if rows <= row_align:
        return rows, rows                       # tiny single full-extent block
    eff_cap = min(cap, rows)
    if rows >= 2 * row_align:
        eff_cap = min(eff_cap, max(row_align, (rows // 2) // row_align * row_align))
    # Largest sublane-aligned divisor of rows <= eff_cap (scan downward).
    t = eff_cap // row_align * row_align
    while t >= row_align:
        if rows % t == 0:
            return t, rows
        t -= row_align
    # No aligned divisor: pad to a tile multiple; tail rows are sliced off.
    n_blocks = -(-rows // eff_cap)
    tile = _round_up(-(-rows // n_blocks), row_align)
    return tile, n_blocks * tile


def qwen2_rotary_half_cache(seq_len, dim, *, base=10000.0, dtype=jnp.float32,
                            tile_rows=None):
    """Builds the rotary cache in its packed, lane-dense, de-duplicated form.

    Returns (cos_p, sin_p, pack): cos_p/sin_p have shape (rows, pack*half),
    half = dim // 2, rows * pack == seq_len (packing only used when it divides).
    Entry (r, j*half + f) == cos((r*pack + j) * inv_freq[f]).
    The reference cache is cos[p, d] = cos_p[p // pack, (p % pack)*half + d % half]
    (the two feature halves of emb are identical by construction).
    This is the recommended cache format for a fused RoPE-apply kernel: it
    halves both the trig work and the HBM footprint of the duplicated layout.
    """
    assert dim % 2 == 0, "rotary dim must be even"
    half = dim // 2
    out_dtype = jnp.dtype(dtype)
    itemsize = out_dtype.itemsize
    row_align = 8 if itemsize >= 4 else (16 if itemsize == 2 else 32)

    # inv_freq — identical expression/values to the torch module's buffer.
    inv_freq = 1.0 / (base ** (jnp.arange(0, dim, 2, dtype=jnp.float32) / dim))

    # Lane-dense packing: `pack` consecutive positions share one 128-lane row.
    if half < 128 and 128 % half == 0 and seq_len % (128 // half) == 0:
        pack = 128 // half
    else:
        pack = 1                   # fallback: one position per row, lane_w = half
    lane_w = pack * half
    rows = -(-seq_len // pack)     # exact when packing is active

    if tile_rows is None:
        tile_rows, padded_rows = _pick_tile_rows(rows, row_align)
    else:
        assert rows % tile_rows == 0 and (tile_rows % row_align == 0 or tile_rows == rows)
        padded_rows = rows
    grid = (padded_rows // tile_rows,)

    inv_freq_lane = jnp.tile(inv_freq, pack).reshape(1, lane_w)

    kernel = functools.partial(_rope_half_cache_kernel, pack=pack)
    cost = pl.CostEstimate(
        flops=6 * padded_rows * lane_w,
        transcendentals=2 * padded_rows * lane_w,
        bytes_accessed=2 * padded_rows * lane_w * itemsize + lane_w * 4,
    )

    cos_p, sin_p = pl.pallas_call(
        kernel,
        out_shape=(
            jax.ShapeDtypeStruct((padded_rows, lane_w), out_dtype),
            jax.ShapeDtypeStruct((padded_rows, lane_w), out_dtype),
        ),
        grid_spec=pltpu.PrefetchScalarGridSpec(
            num_scalar_prefetch=0,
            grid=grid,
            in_specs=[
                pl.BlockSpec((1, lane_w), lambda i: (0, 0)),   # inv_freq (invariant)
            ],
            out_specs=[
                pl.BlockSpec((tile_rows, lane_w), lambda i: (i, 0)),
                pl.BlockSpec((tile_rows, lane_w), lambda i: (i, 0)),
            ],
        ),
        compiler_params=pltpu.CompilerParams(
            dimension_semantics=("parallel",),
            vmem_limit_bytes=32 * 1024 * 1024,
        ),
        cost_estimate=cost,
    )(inv_freq_lane)

    if padded_rows != rows:        # tail padding from the no-divisor fallback
        cos_p = cos_p[:rows]
        sin_p = sin_p[:rows]
    return cos_p, sin_p, pack


def qwen2_rotary_embedding(x, seq_len, dim, base=10000.0, tile_rows=None):
    """Qwen2RotaryEmbedding.forward: returns (cos, sin), each (seq_len, dim), x.dtype.

    NOTE: materialising the reference (seq_len, dim) layout forces an XLA
    relayout + duplication of the packed slab; production consumers should use
    qwen2_rotary_half_cache() and keep the packed half-width layout (or fuse
    the cache build into the RoPE-apply / attention kernel).
    """
    half = dim // 2
    cos_p, sin_p, _ = qwen2_rotary_half_cache(
        seq_len, dim, base=base, dtype=x.dtype, tile_rows=tile_rows)
    cos_h = cos_p.reshape(-1, half)[:seq_len]
    sin_h = sin_p.reshape(-1, half)[:seq_len]
    # emb = concat(freqs, freqs): the two halves are exact duplicates.
    cos = jnp.concatenate([cos_h, cos_h], axis=-1)
    sin = jnp.concatenate([sin_h, sin_h], axis=-1)
    return cos, sin


def _rope_reference(seq_len, dim, base, dtype):
    inv_freq = 1.0 / (base ** (jnp.arange(0, dim, 2, dtype=jnp.float32) / dim))
    t = jnp.arange(seq_len, dtype=jnp.float32)
    freqs = jnp.outer(t, inv_freq)
    emb = jnp.concatenate([freqs, freqs], axis=-1)
    return jnp.cos(emb).astype(dtype), jnp.sin(emb).astype(dtype)


if __name__ == "__main__":
    key = jax.random.PRNGKey(0)

    # --- Small shapes consistent with the module: head_dim = 32, seq_len = 8.
    batch, heads, seq_len, dim = 2, 4, 8, 32
    x = jax.random.normal(key, (batch, heads, seq_len, dim), dtype=jnp.float32)

    cos, sin = qwen2_rotary_embedding(x, seq_len=seq_len, dim=dim, base=10000.0)
    cos, sin = jax.block_until_ready((cos, sin))

    cos_ref, sin_ref = _rope_reference(seq_len, dim, 10000.0, x.dtype)
    assert cos.shape == (seq_len, dim) and sin.shape == (seq_len, dim)
    assert cos.dtype == x.dtype and sin.dtype == x.dtype
    assert jnp.allclose(cos, cos_ref, atol=1e-5)
    assert jnp.allclose(sin, sin_ref, atol=1e-5)

    # --- Longer f32 cache: dim=32 -> half=16, pack=8, rows=1024, tile=512,
    #     grid=(2,) (>=2 parallel steps for v7x megacore).
    seq_len2, dim2 = 8192, 32
    x2 = jnp.zeros((1, 1, seq_len2, dim2), dtype=jnp.float32)
    cos2, sin2 = qwen2_rotary_embedding(x2, seq_len=seq_len2, dim=dim2, base=10000.0)
    cos2, sin2 = jax.block_until_ready((cos2, sin2))
    cos2_ref, sin2_ref = _rope_reference(seq_len2, dim2, 10000.0, x2.dtype)
    # Loose tolerance only absorbs large-argument trig range-reduction ulp
    # differences between the in-kernel (EUP) and XLA cos/sin; indexing errors
    # would be O(1).
    assert jnp.allclose(cos2, cos2_ref, atol=1e-2)
    assert jnp.allclose(sin2, sin2_ref, atol=1e-2)

    # --- bf16 cache at Qwen2-like head_dim=64: half=32, pack=4, rows=1024,
    #     tile=512 (multiple of the 16-row bf16 sublane tiling), grid=(2,).
    seq_len3, dim3 = 4096, 64
    x3 = jnp.zeros((1, 1, seq_len3, dim3), dtype=jnp.bfloat16)
    cos3, sin3 = qwen2_rotary_embedding(x3, seq_len=seq_len3, dim=dim3, base=10000.0)
    cos3, sin3 = jax.block_until_ready((cos3, sin3))
    cos3_ref, sin3_ref = _rope_reference(seq_len3, dim3, 10000.0, x3.dtype)
    assert cos3.dtype == jnp.bfloat16 and sin3.dtype == jnp.bfloat16
    assert jnp.allclose(cos3.astype(jnp.float32), cos3_ref.astype(jnp.float32), atol=2e-2)
    assert jnp.allclose(sin3.astype(jnp.float32), sin3_ref.astype(jnp.float32), atol=2e-2)

    print("KERNEL_OK")
</pallas_src>

<mosaic_0001>
module attributes {stable_mosaic.version = 11 : i64} {
  func.func @_rope_half_cache_kernel(%arg0: i32, %arg1: memref<1x128xf32, #tpu.memory_space<vmem>>, %arg2: memref<1x128xf32, #tpu.memory_space<vmem>>, %arg3: memref<1x128xf32, #tpu.memory_space<vmem>>) attributes {dimension_semantics = [#tpu.dimension_semantics<parallel>], iteration_bounds = array<i64: 1>, scalar_prefetch = 0 : i64, scratch_operands = 0 : i64, tpu.core_type = #tpu.core_type<tc>, window_params = [{pipeline_mode = #tpu.pipeline_mode<synchronous>, transform_indices = @transform_0, window_bounds = array<i64: 1, 128>}, {transform_indices = @transform_1, window_bounds = array<i64: 1, 128>}, {transform_indices = @transform_2, window_bounds = array<i64: 1, 128>}]} {
    %0 = tpu.iota {dimensions = array<i32: 0>} : vector<1x128xi32>
    %c1_i32 = arith.constant 1 : i32
    %1 = arith.muli %arg0, %c1_i32 : i32
    %2 = vector.broadcast %1 : i32 to vector<1x128xi32>
    %3 = arith.addi %2, %0 : vector<1x128xi32>
    %c8_i32 = arith.constant 8 : i32
    %4 = vector.broadcast %c8_i32 : i32 to vector<1x128xi32>
    %5 = arith.muli %3, %4 : vector<1x128xi32>
    %6 = tpu.iota {dimensions = array<i32: 1>} : vector<1x128xi32>
    %c4_i32 = arith.constant 4 : i32
    %7 = vector.broadcast %c4_i32 : i32 to vector<1x128xi32>
    %8 = arith.shrsi %6, %7 : vector<1x128xi32>
    %9 = arith.addi %5, %8 : vector<1x128xi32>
    %10 = arith.sitofp %9 : vector<1x128xi32> to vector<1x128xf32>
    %c0 = arith.constant 0 : index
    %c0_0 = arith.constant 0 : index
    %11 = vector.load %arg1[%c0, %c0_0] : memref<1x128xf32, #tpu.memory_space<vmem>>, vector<1x128xf32>
    %12 = arith.mulf %10, %11 : vector<1x128xf32>
    %13 = math.cos %12 : vector<1x128xf32>
    %c0_1 = arith.constant 0 : index
    %c0_2 = arith.constant 0 : index
    %14 = vector.load %arg2[%c0_1, %c0_2] : memref<1x128xf32, #tpu.memory_space<vmem>>, vector<1x128xf32>
    tpu.vector_store %arg2[%c0_1, %c0_2], %13 {strides = array<i32>} : memref<1x128xf32, #tpu.memory_space<vmem>>, vector<1x128xf32>,
    %15 = math.sin %12 : vector<1x128xf32>
    %c0_3 = arith.constant 0 : index
    %c0_4 = arith.constant 0 : index
    %16 = vector.load %arg3[%c0_3, %c0_4] : memref<1x128xf32, #tpu.memory_space<vmem>>, vector<1x128xf32>
    tpu.vector_store %arg3[%c0_3, %c0_4], %15 {strides = array<i32>} : memref<1x128xf32, #tpu.memory_space<vmem>>, vector<1x128xf32>,
    return
  }
  func.func @transform_0(%arg0: i32) -> (i32, i32) {
    %c0_i32 = arith.constant 0 : i32
    %c0_i32_0 = arith.constant 0 : i32
    %c0_i32_1 = arith.constant 0 : i32
    return %c0_i32, %c0_i32_0 : i32, i32
  }
  func.func @transform_1(%arg0: i32) -> (i32, i32) {
    %c0_i32 = arith.constant 0 : i32
    %c0_i32_0 = arith.constant 0 : i32
    return %arg0, %c0_i32 : i32, i32
  }
  func.func @transform_2(%arg0: i32) -> (i32, i32) {
    %c0_i32 = arith.constant 0 : i32
    %c0_i32_0 = arith.constant 0 : i32
    return %arg0, %c0_i32 : i32, i32
  }
}

</mosaic_0001>

<bundles_post_ra>
// kernel: tpu_custom_call.1
= control target key start
LH: loop header
LB: loop body
LE: loop exit
PB: predicated region body
PF: predicated region fallthrough
CT: control target
= control target key end

     0   :  { %8 = vsyncpa [#allocation3], 0  ;;  %s557_s0 = inlined_call_operand.hbm [shape: f32[1,128], index: 0, kind: input, shape index: {}]   ;;  %s558_s1 = inlined_call_operand.hbm [shape: f32[1,128], index: 1, kind: output, shape index: {0}]   ;;  %s559_s2 = inlined_call_operand.hbm [shape: f32[1,128], index: 2, kind: output, shape index: {1}]  }
   0x1   :  { %9 = vsyncpa [#allocation4], 0 }
   0x2   :  { %10 = vsyncpa [#allocation7], 0  ;;  %s16_s11 = sshll.u32 %s557_s0, 4  ;;  %s476_s12 = smov [#allocation2]   ;;  %s17_s11 = int_to_ptr.hbm [resolvable:$true] %s16_s11 }
   0x3   :  { %s18_s13 = sshll.u32 %s476_s12, 4  ;;  %s19_s13 = int_to_ptr.vmem [resolvable:$true] %s18_s13 }
   0x4   :  { %21 = dma.hbm_to_vmem [thread:$0]  %s17_s11, 16, %s19_s13, [#allocation3]  }
   0x5   :  { %470 = dma.done.wait [#allocation3], 16  }
   0x6   :  { %471 = vsyncadd [#allocation3], 4294967280  ;;  %v26_v0 = vlaneseq  ;;  %v36_v6 = vld [vmem:[#allocation2] sm:$0x1]  ;;  %v477_v20 = vmov 683565275  }
   0x7   :  { %v478_v22 = vmov 2475754826   ;;  %v479_v24 = vmov 2131351028   ;;  %v480_v26 = vmov 2102212464  }
   0x8   :  { %v27_v1 = vshrl.u32 %v26_v0, 7  ;;  %v32_v2 = vand.u32 127, %v26_v0  ;;  %v481_v28 = vmov 920167782   ;;  %v482_v34 = vmov 1326507024  }
   0x9   :  { %s484_s0 = smov [#allocation5]   ;;  %s356_s17 = sshll.u32 %s558_s1, 4  ;;  %s357_s17 = int_to_ptr.hbm [resolvable:$true] %s356_s17 }
   0xa   :  { %v30_v3 = vmul.u32 8, %v27_v1  ;;  %v33_v4 = vshra.s32 %v32_v2, 4  ;;  %s354_s14 = sshll.u32 %s484_s0, 4  ;;  %s485_s18 = smov [#allocation6]   ;;  %s355_s14 = int_to_ptr.vmem [resolvable:$true] %s354_s14 }
   0xb   :  { %s365_s19 = sshll.u32 %s485_s18, 4  ;;  %s367_s22 = sshll.u32 %s559_s2, 4  ;;  %s366_s19 = int_to_ptr.vmem [resolvable:$true] %s365_s19  ;;  %s368_s22 = int_to_ptr.hbm [resolvable:$true] %s367_s22 }
   0xc   :  { %v34_v5 = vadd.s32 %v33_v4, %v30_v3 }
   0xe   :  { %v35_v7 = vcvt.s32.f32 %v34_v5 }
  0x10   :  { %v504_v8 = vmul.f32 %v36_v6, %v35_v7 }
  0x12   :  { %v41_v9 = vand.u32 2139095040, %v504_v8  ;;  %v38_v11 = vand.u32 2147483647, %v504_v8  ;;  %vm40_vm12 = vcmp.lt.s32.totalorder %v504_v8, 0 }
  0x14   :  { %v42_v10 = vshrl.u32 %v41_v9, 23  ;;  %v45_v14 = vand.u32 8388607, %v38_v11  ;;  %v483_v9 = vmov 0   ;;  %vm39_vm13 = vcmp.le.f32.partialorder %v38_v11, 0.7853982 }
  0x16   :  { %v382_v12 = vadd.s32 4294967169, %v42_v10  ;;  %v46_v17 = vor.u32 8388608, %v45_v14 }
  0x18   :  { %v48_v13 = vadd.s32 1, %v382_v12  ;;  %v513_v36 = vshll.u32 %v46_v17, 8 }
  0x1a   :  { %vm49_vm0 = vcmp.gt.s32.totalorder %v48_v13, 0  ;;  %v87_v48 = vand.u32 65535, %v513_v36  ;;  %v88_v49 = vshrl.u32 %v513_v36, 16 }
  0x1b   :  { %v50_v15 = vsel %vm49_vm0, %v48_v13, 0 }
  0x1c   :  { %v52_v16 = vand.u32 31, %v50_v15  ;;  %v510_v18 = vshrl.u32 %v50_v15, 5 }
  0x1e   :  { %v53_v19 = vsub.s32 32, %v52_v16  ;;  %v55_v21 = vshll.u32 %v477_v20, %v52_v16  ;;  %v58_v23 = vshll.u32 %v478_v22, %v52_v16  ;;  %v61_v25 = vshll.u32 %v479_v24, %v52_v16 }
  0x1f   :  { %v64_v27 = vshll.u32 %v480_v26, %v52_v16  ;;  %v67_v29 = vshll.u32 %v481_v28, %v52_v16  ;;  %vm70_vm1 = vcmp.lt.s32.totalorder %v510_v18, 1  ;;  %vm73_vm2 = vcmp.lt.s32.totalorder %v510_v18, 4 }
  0x20   :  { %v56_v30 = vshrl.u32 %v478_v22, %v53_v19  ;;  %v59_v31 = vshrl.u32 %v479_v24, %v53_v19  ;;  %v62_v32 = vshrl.u32 %v480_v26, %v53_v19  ;;  %v65_v33 = vshrl.u32 %v481_v28, %v53_v19 }
  0x21   :  { %v68_v35 = vshrl.u32 %v482_v34, %v53_v19  ;;  %vm72_vm3 = vcmp.lt.s32.totalorder %v510_v18, 3  ;;  %vm71_vm4 = vcmp.lt.s32.totalorder %v510_v18, 2  ;;  %v54_v56 = vshrl.u32 %v477_v20, %v53_v19 }
  0x22   :  { %v57_v37 = vor.u32 %v56_v30, %v55_v21  ;;  %v60_v38 = vor.u32 %v59_v31, %v58_v23  ;;  %v63_v39 = vor.u32 %v62_v32, %v61_v25  ;;  %v66_v40 = vor.u32 %v65_v33, %v64_v27 }
  0x23   :  { %v69_v41 = vor.u32 %v68_v35, %v67_v29 }
  0x24   :  { %v78_v42 = vsel %vm70_vm1, %v57_v37, %v60_v38  ;;  %v82_v43 = vsel %vm70_vm1, %v60_v38, %v63_v39  ;;  %v79_v44 = vsel %vm73_vm2, %v66_v40, 920167782  ;;  %v74_v5 = vsel %vm70_vm1, %v54_v56, %v57_v37 }
  0x25   :  { %v83_v45 = vsel %vm73_vm2, %v69_v41, 1326507024  ;;  %v80_v46 = vsel %vm72_vm3, %v63_v39, %v79_v44  ;;  %v75_v7 = vsel %vm73_vm2, %v63_v39, 2102212464 }
  0x26   :  { %v84_v47 = vsel %vm72_vm3, %v66_v40, %v83_v45  ;;  %v81_v50 = vsel %vm71_vm4, %v78_v42, %v80_v46  ;;  %v76_v20 = vsel %vm72_vm3, %v60_v38, %v75_v7 }
  0x27   :  { %v85_v51 = vsel %vm71_vm4, %v82_v43, %v84_v47  ;;  %v111_v54 = vand.u32 65535, %v81_v50  ;;  %v112_v55 = vshrl.u32 %v81_v50, 16  ;;  %v77_v28 = vsel %vm71_vm4, %v74_v5, %v76_v20 }
  0x28   :  { %v89_v52 = vand.u32 65535, %v85_v51  ;;  %v90_v53 = vshrl.u32 %v85_v51, 16  ;;  %v131_v32 = vmul.u32 %v513_v36, %v77_v28  ;;  %vm181_vm4 = vweird.f32 %v504_v8 }
  0x29   :  { %v113_v60 = vmul.u32 %v111_v54, %v87_v48  ;;  %v114_v61 = vmul.u32 %v112_v55, %v87_v48  ;;  %v115_v62 = vmul.u32 %v111_v54, %v88_v49  ;;  %v116_v2 = vmul.u32 %v112_v55, %v88_v49 }
  0x2a   :  { %v91_v57 = vmul.u32 %v89_v52, %v87_v48  ;;  %v92_v58 = vmul.u32 %v90_v53, %v87_v48  ;;  %v93_v59 = vmul.u32 %v89_v52, %v88_v49  ;;  %v94_v63 = vmul.u32 %v90_v53, %v88_v49 }
  0x2b   :  { %v117_v3 = vshll.u32 %v114_v61, 16  ;;  %v119_v4 = vshll.u32 %v115_v62, 16  ;;  %v118_v17 = vshrl.u32 %v114_v61, 16  ;;  %v120_v24 = vshrl.u32 %v115_v62, 16 }
  0x2c   :  { %v95_v0 = vshll.u32 %v92_v58, 16  ;;  %v97_v1 = vshll.u32 %v93_v59, 16  ;;  %v96_v13 = vshrl.u32 %v92_v58, 16  ;;  %v98_v21 = vshrl.u32 %v93_v59, 16 }
  0x2d   :  { %vm121_vm6 = vc.u32 %v113_v60, %v117_v3  ;;  %v123_v12 = vadd.s32 %v117_v3, %v113_v60 }
  0x2e   :  { %vm99_vm5 = vc.u32 %v91_v57, %v95_v0  ;;  %v101_v6 = vadd.s32 %v95_v0, %v91_v57  ;;  %v122_v15 = vsel %vm121_vm6, 1, %v483_v9 }
  0x2f   :  { %v100_v10 = vsel %vm99_vm5, 1, %v483_v9  ;;  %v124_v19 = vadd.s32 %v122_v15, %v116_v2  ;;  %vm125_vm8 = vc.u32 %v123_v12, %v119_v4  ;;  %v127_v27 = vadd.s32 %v123_v12, %v119_v4 }
  0x30   :  { %v102_v14 = vadd.s32 %v100_v10, %v94_v63  ;;  %vm103_vm7 = vc.u32 %v101_v6, %v97_v1  ;;  %v126_v23 = vsel %vm125_vm8, 1, %v483_v9 }
  0x31   :  { %v104_v16 = vsel %vm103_vm7, 1, %v483_v9  ;;  %v128_v25 = vadd.s32 %v126_v23, %v124_v19 }
  0x32   :  { %v106_v22 = vadd.s32 %v104_v16, %v102_v14 }
  0x33   :  { %v129_v29 = vadd.s32 %v128_v25, %v118_v17 }
  0x34   :  { %v107_v26 = vadd.s32 %v106_v22, %v96_v13 }
  0x35   :  { %v130_v31 = vadd.s32 %v129_v29, %v120_v24 }
  0x36   :  { %v108_v30 = vadd.s32 %v107_v26, %v98_v21 }
  0x37   :  { %v134_v33 = vadd.s32 1, %v130_v31 }
  0x38   :  { %vm133_vm9 = vc.u32 %v108_v30, %v127_v27  ;;  %v132_v18 = vadd.s32 %v127_v27, %v108_v30 }
  0x39   :  { %v135_v34 = vsel %vm133_vm9, %v134_v33, %v130_v31 }
  0x3a   :  { %v136_v35 = vadd.s32 %v135_v34, %v131_v32 }
  0x3c   :  { %v137_v37 = vadd.s32 536870912, %v136_v35 }
  0x3e   :  { %v138_v38 = vshrl.u32 %v137_v37, 30 }
  0x40   :  { %v139_v39 = vshll.u32 %v138_v38, 30  ;;  %v162_v56 = vsub.s32 4, %v138_v38 }
  0x42   :  { %v140_v40 = vsub.s32 %v136_v35, %v139_v39  ;;  %v163_v59 = vsel %vm40_vm12, %v162_v56, %v138_v38 }
  0x43   :  { %v165_v62 = vsel %vm39_vm13, 0, %v163_v59 }
  0x44   :  { %vm141_vm10 = vcmp.lt.s32.totalorder %v140_v40, 0  ;;  %v142_v41 = vsub.s32 0, %v140_v40  ;;  %v337_v3 = vadd.s32 3, %v165_v62  ;;  %v182_v9 = vand.u32 3, %v165_v62 }
  0x46   :  { %v143_v42 = vsel %vm141_vm10, %v142_v41, %v140_v40  ;;  %v338_v10 = vand.u32 3, %v337_v3  ;;  %vm187_vm14 = vcmp.eq.s32.totalorder %v182_v9, 2  ;;  %vm183_vm0 = vcmp.lt.s32.totalorder %v182_v9, 2 }
  0x47   :  { %v144_v43 = vclz %v143_v42  ;;  %vm184_vm1 = vcmp.eq.s32.totalorder %v182_v9, 0 }
  0x48   :  { %vm343_vm15 = vcmp.eq.s32.totalorder %v338_v10, 2  ;;  %vm340_vm2 = vcmp.eq.s32.totalorder %v338_v10, 0  ;;  %vm339_vm3 = vcmp.lt.s32.totalorder %v338_v10, 2 }
  0x49   :  { %v383_v44 = vadd.s32 4294967294, %v144_v43 }
  0x4b   :  { %vm384_vm11 = vcmp.lt.s32.totalorder %v383_v44, 0 }
  0x4c   :  { %v147_v45 = vsel %vm384_vm11, 0, %v383_v44 }
  0x4d   :  { %v148_v46 = vsub.s32 32, %v147_v45  ;;  %v149_v47 = vshll.u32 %v140_v40, %v147_v45  ;;  %v152_v48 = vsub.s32 4294967266, %v147_v45 }
  0x4f   :  { %v150_v36 = vshrl.u32 %v132_v18, %v148_v46  ;;  %v153_v49 = vadd.s32 127, %v152_v48 }
  0x51   :  { %v151_v50 = vor.u32 %v150_v36, %v149_v47  ;;  %v154_v51 = vshll.u32 %v153_v49, 23 }
  0x53   :  { %v155_v52 = vor.u32 4788187, %v154_v51  ;;  %v158_v53 = vcvt.s32.f32 %v151_v50 }
  0x55   :  { %v156_v54 = vand.u32 2147483647, %v155_v52 }
  0x57   :  { %v159_v55 = vmul.f32 %v158_v53, %v156_v54 }
  0x59   :  { %v160_v57 = vxor.u32 2147483648, %v159_v55 }
  0x5b   :  { %v161_v58 = vsel %vm40_vm12, %v160_v57, %v159_v55 }
  0x5c   :  { %v164_v60 = vsel %vm39_vm13, %v504_v8, %v161_v58 }
  0x5d   :  { %v166_v61 = vmul.f32 %v164_v60, %v164_v60 }
  0x5f   :  { %v167_v63 = vmul.f32 -0.001358992, %v166_v61  ;;  %v174_v0 = vmul.f32 -0.00019511016, %v166_v61 }
  0x61   :  { %v168_v1 = vadd.f32 0.041655596, %v167_v63  ;;  %v175_v2 = vadd.f32 0.008332121, %v174_v0 }
  0x63   :  { %v169_v4 = vmul.f32 %v168_v1, %v166_v61  ;;  %v176_v5 = vmul.f32 %v175_v2, %v166_v61 }
  0x65   :  { %v170_v6 = vadd.f32 -0.4999988, %v169_v4  ;;  %v177_v7 = vadd.f32 -0.16666654, %v176_v5 }
  0x67   :  { %v171_v12 = vmul.f32 %v170_v6, %v166_v61  ;;  %v178_v11 = vmul.f32 %v177_v7, %v166_v61 }
  0x69   :  { %v172_v13 = vadd.f32 1.0, %v171_v12  ;;  %v179_v14 = vadd.f32 1.0, %v178_v11 }
  0x6b   :  { %v180_v15 = vmul.f32 %v179_v14, %v164_v60  ;;  %v188_v16 = vxor.u32 2147483648, %v172_v13 }
  0x6d   :  { %v185_v17 = vxor.u32 2147483648, %v180_v15  ;;  %v189_v19 = vsel %vm187_vm14, %v188_v16, %v180_v15  ;;  %v345_v20 = vsel %vm343_vm15, %v188_v16, %v180_v15 }
  0x6f   :  { %v186_v21 = vsel %vm184_vm1, %v172_v13, %v185_v17  ;;  %v342_v22 = vsel %vm340_vm2, %v172_v13, %v185_v17 }
  0x70   :  { %v190_v23 = vsel %vm183_vm0, %v186_v21, %v189_v19  ;;  %v346_v24 = vsel %vm339_vm3, %v342_v22, %v345_v20 }
  0x71   :  { %v191_v25 = vsel %vm181_vm4, nan, %v190_v23  ;;  %v347_v26 = vsel %vm181_vm4, nan, %v346_v24 }
  0x72   :  { %192 = vst [vmem:[#allocation5] sm:$0x1] %v191_v25 }
  0x73   :  { %348 = vst [vmem:[#allocation6] sm:$0x1] %v347_v26  ;;  %359 = dma.vmem_to_hbm [thread:$0]  %s355_s14, 16, %s357_s17, [#allocation4]  }
  0x74   :  { %370 = dma.vmem_to_hbm [thread:$0]  %s366_s19, 16, %s368_s22, [#allocation7]  }
  0x75   :  { %472 = dma.done.wait [#allocation4], 16  }
  0x76   :  { %473 = vsyncadd [#allocation4], 4294967280 }
  0x77   :  { %474 = dma.done.wait [#allocation7], 16  }
  0x78   :  { %475 = vsyncadd [#allocation7], 4294967280 }
  0x79   :  { %379 = vsyncpa [#allocation3], 1 }
  0x7a   :  { %380 = vsyncpa [#allocation4], 1 }
  0x7b   :  { %381 = vsyncpa [#allocation7], 1 }

</bundles_post_ra>
